<compile_context>
chip_gen: v5e
topology: v5e:2x2
jax: 0.10.0
libtpu: 0.0.40
codegen_flags: <defaults>
</compile_context>

<pallas_src>
from functools import partial

import jax
import jax.numpy as jnp
from jax.experimental import pallas as pl
from jax.experimental.pallas import tpu as pltpu

_LANES = 128  # lane-dense output width


def _round_up(n, m):
    return ((n + m - 1) // m) * m


def _leaky_relu(x, slope=0.2):
    return jnp.where(x > 0, x, slope * x)


def discriminator_kernel(x_ref, w1_ref, b1_ref, w2_ref, b2_ref, w3_ref, b3_ref,
                         o_ref, *, approx_recip):
    # Layer 1: [tb, D] @ [D, 512] on the MXU with f32 accumulation.
    h = jnp.dot(x_ref[...], w1_ref[...], preferred_element_type=jnp.float32)
    h = _leaky_relu(h + b1_ref[...])                       # f32 VPU math

    # Layer 2: [tb, 512] @ [512, 256].
    h = jnp.dot(h.astype(w2_ref.dtype), w2_ref[...],
                preferred_element_type=jnp.float32)
    h = _leaky_relu(h + b2_ref[...])

    # Layer 3: out_features == 1 -> VPU multiply + XLU lane reduction instead
    # of an N=1 MXU matmul.  w3_ref is the weight row, shape (1, 256), f32.
    logit = jnp.sum(h * w3_ref[...], axis=-1, keepdims=True) + b3_ref[...]  # (tb, 1)

    denom = 1.0 + jnp.exp(-logit)                          # EUP exp
    if approx_recip:
        sig = pl.reciprocal(denom, approx=True)            # EUP slot, ~free
    else:
        sig = 1.0 / denom                                  # exact for f32 check

    # Lane-dense store: broadcast the per-row scalar across all 128 lanes so
    # the output block is a full-width unmasked vst; the wrapper keeps col 0.
    o_ref[...] = jnp.broadcast_to(sig, o_ref.shape).astype(o_ref.dtype)


def discriminator_forward(x, params, *, tb=256, use_bf16=True):
    """x: [B, input_dim] float32.
    params: dict w1,b1,w2,b2,w3,b3 with w* as [in_features, out_features] and
    b* as [1, out_features]."""
    B, D = x.shape

    # MXU-aligned batch tile for large batches, 8-aligned for tiny ones so a
    # small batch doesn't pay for 256 rows of padded compute.
    tb_eff = min(tb, _round_up(B, 8))
    n_tiles = pl.cdiv(B, tb_eff)
    B_pad = n_tiles * tb_eff
    if B_pad != B:
        x = jnp.pad(x, ((0, B_pad - B), (0, 0)))

    w1, b1 = params["w1"], params["b1"]
    w2, b2 = params["w2"], params["b2"]
    w3, b3 = params["w3"], params["b3"]
    w3_row = w3.reshape(1, -1)          # (1, 256) row used by the VPU reduction

    if use_bf16:
        # Halves HBM traffic for x / W1 / W2 and doubles MXU rate on v6e/v7x.
        x = x.astype(jnp.bfloat16)
        w1 = w1.astype(jnp.bfloat16)
        w2 = w2.astype(jnp.bfloat16)
    # Biases and w3_row stay f32: bias add / reduction / sigmoid run in f32.

    # Weights/biases use a grid-constant index_map (fetched once, reused).
    full = lambda arr: pl.BlockSpec(arr.shape, lambda i: (0, 0))
    # NOTE: for very large input_dim, additionally raise vmem_limit_bytes via
    # pltpu.CompilerParams(vmem_limit_bytes=...) or tile the K dimension.

    kernel = partial(discriminator_kernel, approx_recip=use_bf16)

    out = pl.pallas_call(
        kernel,
        out_shape=jax.ShapeDtypeStruct((B_pad, _LANES), jnp.float32),
        grid_spec=pltpu.PrefetchScalarGridSpec(
            num_scalar_prefetch=0,
            grid=(n_tiles,),            # >= 2 tiles lets v7x's dual TCs split the batch
            in_specs=[
                pl.BlockSpec((tb_eff, D), lambda i: (i, 0)),  # x tiled over batch
                full(w1), full(b1),
                full(w2), full(b2),
                full(w3_row), full(b3),
            ],
            out_specs=pl.BlockSpec((tb_eff, _LANES), lambda i: (i, 0)),
        ),
        compiler_params=pltpu.CompilerParams(
            dimension_semantics=("parallel",),
        ),
    )(x, w1, b1, w2, b2, w3_row, b3)

    return out[:B, :1]


def init_params(key, input_dim):
    """Deterministic PyTorch-style Linear init: U(-1/sqrt(fan_in), 1/sqrt(fan_in))."""
    dims = [(input_dim, 512), (512, 256), (256, 1)]
    params = {}
    for idx, (fan_in, fan_out) in enumerate(dims, start=1):
        key, kw, kb = jax.random.split(key, 3)
        bound = 1.0 / jnp.sqrt(fan_in)
        params[f"w{idx}"] = jax.random.uniform(
            kw, (fan_in, fan_out), jnp.float32, -bound, bound)
        params[f"b{idx}"] = jax.random.uniform(
            kb, (1, fan_out), jnp.float32, -bound, bound)
    return params


def reference_forward(x, params):
    h = x @ params["w1"] + params["b1"]
    h = jnp.where(h > 0, h, 0.2 * h)
    h = h @ params["w2"] + params["b2"]
    h = jnp.where(h > 0, h, 0.2 * h)
    h = h @ params["w3"] + params["b3"]
    return jax.nn.sigmoid(h)


if __name__ == "__main__":
    key = jax.random.PRNGKey(0)
    kx, kp = jax.random.split(key)

    batch, input_dim = 8, 32
    x = jax.random.normal(kx, (batch, input_dim), jnp.float32)
    params = init_params(kp, input_dim)

    ref = reference_forward(x, params)

    # Exact-precision path (f32 matmuls): tight check.
    out_f32 = jax.block_until_ready(discriminator_forward(x, params, use_bf16=False))
    assert out_f32.shape == (batch, 1)
    assert jnp.allclose(out_f32, ref, atol=1e-5, rtol=1e-5), "f32 mismatch vs reference"

    # Fast path (bf16 matmul inputs, f32 accumulation, approx reciprocal): loose check.
    out_bf16 = jax.block_until_ready(discriminator_forward(x, params, use_bf16=True))
    assert out_bf16.shape == (batch, 1)
    assert jnp.max(jnp.abs(out_bf16 - ref)) < 2e-2, "bf16 mismatch vs reference"

    # Larger batch exercises the multi-tile / padded path.
    xb = jax.random.normal(kx, (300, input_dim), jnp.float32)
    out_big = jax.block_until_ready(discriminator_forward(xb, params, use_bf16=True))
    assert out_big.shape == (300, 1)
    assert jnp.max(jnp.abs(out_big - reference_forward(xb, params))) < 2e-2

    print("KERNEL_OK")
</pallas_src>

<mosaic_0001>
module attributes {stable_mosaic.version = 11 : i64} {
  func.func @discriminator_kernel(%arg0: i32, %arg1: memref<8x32xf32, #tpu.memory_space<vmem>>, %arg2: memref<32x512xf32, #tpu.memory_space<vmem>>, %arg3: memref<1x512xf32, #tpu.memory_space<vmem>>, %arg4: memref<512x256xf32, #tpu.memory_space<vmem>>, %arg5: memref<1x256xf32, #tpu.memory_space<vmem>>, %arg6: memref<1x256xf32, #tpu.memory_space<vmem>>, %arg7: memref<1x1xf32, #tpu.memory_space<vmem>>, %arg8: memref<8x128xf32, #tpu.memory_space<vmem>>) attributes {dimension_semantics = [#tpu.dimension_semantics<parallel>], iteration_bounds = array<i64: 1>, scalar_prefetch = 0 : i64, scratch_operands = 0 : i64, tpu.core_type = #tpu.core_type<tc>, window_params = [{transform_indices = @transform_0, window_bounds = array<i64: 8, 32>}, {pipeline_mode = #tpu.pipeline_mode<synchronous>, transform_indices = @transform_1, window_bounds = array<i64: 32, 512>}, {pipeline_mode = #tpu.pipeline_mode<synchronous>, transform_indices = @transform_2, window_bounds = array<i64: 1, 512>}, {pipeline_mode = #tpu.pipeline_mode<synchronous>, transform_indices = @transform_3, window_bounds = array<i64: 512, 256>}, {pipeline_mode = #tpu.pipeline_mode<synchronous>, transform_indices = @transform_4, window_bounds = array<i64: 1, 256>}, {pipeline_mode = #tpu.pipeline_mode<synchronous>, transform_indices = @transform_5, window_bounds = array<i64: 1, 256>}, {pipeline_mode = #tpu.pipeline_mode<synchronous>, transform_indices = @transform_6, window_bounds = array<i64: 1, 1>}, {transform_indices = @transform_7, window_bounds = array<i64: 8, 128>}]} {
    %c0 = arith.constant 0 : index
    %c0_0 = arith.constant 0 : index
    %0 = vector.load %arg1[%c0, %c0_0] : memref<8x32xf32, #tpu.memory_space<vmem>>, vector<8x32xf32>
    %c0_1 = arith.constant 0 : index
    %c0_2 = arith.constant 0 : index
    %1 = vector.load %arg2[%c0_1, %c0_2] : memref<32x512xf32, #tpu.memory_space<vmem>>, vector<32x512xf32>
    %cst = arith.constant dense<0.000000e+00> : vector<8x512xf32>
    %2 = tpu.matmul %0, %1, %cst {dimension_numbers = #tpu.dot_dimension_numbers<[1], [0], [0], [1], [0, 0, 1, 1], [], []>} : vector<8x32xf32>, vector<32x512xf32>, vector<8x512xf32> -> vector<8x512xf32>
    %c0_3 = arith.constant 0 : index
    %c0_4 = arith.constant 0 : index
    %3 = vector.load %arg3[%c0_3, %c0_4] : memref<1x512xf32, #tpu.memory_space<vmem>>, vector<1x512xf32>
    %4 = vector.broadcast %3 : vector<1x512xf32> to vector<8x512xf32>
    %5 = arith.addf %2, %4 : vector<8x512xf32>
    %cst_5 = arith.constant 0.000000e+00 : f32
    %6 = vector.broadcast %cst_5 : f32 to vector<8x512xf32>
    %7 = arith.cmpf ogt, %5, %6 : vector<8x512xf32>
    %cst_6 = arith.constant 2.000000e-01 : f32
    %8 = vector.broadcast %cst_6 : f32 to vector<8x512xf32>
    %9 = arith.mulf %8, %5 : vector<8x512xf32>
    %10 = arith.select %7, %5, %9 : vector<8x512xi1>, vector<8x512xf32>
    %c0_7 = arith.constant 0 : index
    %c0_8 = arith.constant 0 : index
    %11 = vector.load %arg4[%c0_7, %c0_8] : memref<512x256xf32, #tpu.memory_space<vmem>>, vector<512x256xf32>
    %cst_9 = arith.constant dense<0.000000e+00> : vector<8x256xf32>
    %12 = tpu.matmul %10, %11, %cst_9 {dimension_numbers = #tpu.dot_dimension_numbers<[1], [0], [0], [1], [0, 0, 1, 1], [], []>} : vector<8x512xf32>, vector<512x256xf32>, vector<8x256xf32> -> vector<8x256xf32>
    %c0_10 = arith.constant 0 : index
    %c0_11 = arith.constant 0 : index
    %13 = vector.load %arg5[%c0_10, %c0_11] : memref<1x256xf32, #tpu.memory_space<vmem>>, vector<1x256xf32>
    %14 = vector.broadcast %13 : vector<1x256xf32> to vector<8x256xf32>
    %15 = arith.addf %12, %14 : vector<8x256xf32>
    %cst_12 = arith.constant 0.000000e+00 : f32
    %16 = vector.broadcast %cst_12 : f32 to vector<8x256xf32>
    %17 = arith.cmpf ogt, %15, %16 : vector<8x256xf32>
    %cst_13 = arith.constant 2.000000e-01 : f32
    %18 = vector.broadcast %cst_13 : f32 to vector<8x256xf32>
    %19 = arith.mulf %18, %15 : vector<8x256xf32>
    %20 = arith.select %17, %15, %19 : vector<8x256xi1>, vector<8x256xf32>
    %c0_14 = arith.constant 0 : index
    %c0_15 = arith.constant 0 : index
    %21 = vector.load %arg6[%c0_14, %c0_15] : memref<1x256xf32, #tpu.memory_space<vmem>>, vector<1x256xf32>
    %22 = vector.broadcast %21 : vector<1x256xf32> to vector<8x256xf32>
    %23 = arith.mulf %20, %22 : vector<8x256xf32>
    %cst_16 = arith.constant dense<0.000000e+00> : vector<8xf32>
    %24 = vector.multi_reduction <add>, %23, %cst_16 [1] : vector<8x256xf32> to vector<8xf32>
    %25 = vector.shape_cast %24 : vector<8xf32> to vector<8x1xf32>
    %c0_17 = arith.constant 0 : index
    %c0_18 = arith.constant 0 : index
    %26 = vector.load %arg7[%c0_17, %c0_18] : memref<1x1xf32, #tpu.memory_space<vmem>>, vector<1x1xf32>
    %27 = vector.broadcast %26 : vector<1x1xf32> to vector<8x1xf32>
    %28 = arith.addf %25, %27 : vector<8x1xf32>
    %cst_19 = arith.constant 0.000000e+00 : f32
    %29 = vector.broadcast %cst_19 : f32 to vector<8x1xf32>
    %30 = arith.subf %29, %28 : vector<8x1xf32>
    %31 = math.exp %30 : vector<8x1xf32>
    %cst_20 = arith.constant 1.000000e+00 : f32
    %32 = vector.broadcast %cst_20 : f32 to vector<8x1xf32>
    %33 = arith.addf %32, %31 : vector<8x1xf32>
    %cst_21 = arith.constant 1.000000e+00 : f32
    %34 = vector.broadcast %cst_21 : f32 to vector<8x1xf32>
    %35 = arith.divf %34, %33 : vector<8x1xf32>
    %36 = vector.shape_cast %35 : vector<8x1xf32> to vector<8x1xf32>
    %37 = vector.broadcast %36 : vector<8x1xf32> to vector<8x128xf32>
    %c0_22 = arith.constant 0 : index
    %c0_23 = arith.constant 0 : index
    %38 = vector.load %arg8[%c0_22, %c0_23] : memref<8x128xf32, #tpu.memory_space<vmem>>, vector<8x128xf32>
    tpu.vector_store %arg8[%c0_22, %c0_23], %37 {strides = array<i32>} : memref<8x128xf32, #tpu.memory_space<vmem>>, vector<8x128xf32>,
    return
  }
  func.func @transform_0(%arg0: i32) -> (i32, i32) {
    %c0_i32 = arith.constant 0 : i32
    %c0_i32_0 = arith.constant 0 : i32
    return %arg0, %c0_i32 : i32, i32
  }
  func.func @transform_1(%arg0: i32) -> (i32, i32) {
    %c0_i32 = arith.constant 0 : i32
    %c0_i32_0 = arith.constant 0 : i32
    %c0_i32_1 = arith.constant 0 : i32
    return %c0_i32, %c0_i32_0 : i32, i32
  }
  func.func @transform_2(%arg0: i32) -> (i32, i32) {
    %c0_i32 = arith.constant 0 : i32
    %c0_i32_0 = arith.constant 0 : i32
    %c0_i32_1 = arith.constant 0 : i32
    return %c0_i32, %c0_i32_0 : i32, i32
  }
  func.func @transform_3(%arg0: i32) -> (i32, i32) {
    %c0_i32 = arith.constant 0 : i32
    %c0_i32_0 = arith.constant 0 : i32
    %c0_i32_1 = arith.constant 0 : i32
    return %c0_i32, %c0_i32_0 : i32, i32
  }
  func.func @transform_4(%arg0: i32) -> (i32, i32) {
    %c0_i32 = arith.constant 0 : i32
    %c0_i32_0 = arith.constant 0 : i32
    %c0_i32_1 = arith.constant 0 : i32
    return %c0_i32, %c0_i32_0 : i32, i32
  }
  func.func @transform_5(%arg0: i32) -> (i32, i32) {
    %c0_i32 = arith.constant 0 : i32
    %c0_i32_0 = arith.constant 0 : i32
    %c0_i32_1 = arith.constant 0 : i32
    return %c0_i32, %c0_i32_0 : i32, i32
  }
  func.func @transform_6(%arg0: i32) -> (i32, i32) {
    %c0_i32 = arith.constant 0 : i32
    %c0_i32_0 = arith.constant 0 : i32
    %c0_i32_1 = arith.constant 0 : i32
    return %c0_i32, %c0_i32_0 : i32, i32
  }
  func.func @transform_7(%arg0: i32) -> (i32, i32) {
    %c0_i32 = arith.constant 0 : i32
    %c0_i32_0 = arith.constant 0 : i32
    return %arg0, %c0_i32 : i32, i32
  }
}

</mosaic_0001>

<bundles_post_ra>
// kernel: tpu_custom_call.1
= control target key start
LH: loop header
LB: loop body
LE: loop exit
PB: predicated region body
PF: predicated region fallthrough
CT: control target
= control target key end

     0   :  { %s793_s0 = inlined_call_operand.hbm [shape: f32[8,32], index: 0, kind: input, shape index: {}]   ;;  %s794_s1 = inlined_call_operand.hbm [shape: f32[32,512], index: 1, kind: input, shape index: {}]   ;;  %s795_s2 = inlined_call_operand.hbm [shape: f32[1,512], index: 2, kind: input, shape index: {}]   ;;  %s796_s3 = inlined_call_operand.hbm [shape: f32[512,256], index: 3, kind: input, shape index: {}]   ;;  %s797_s4 = inlined_call_operand.vmem [shape: f32[1,256], index: 4, kind: input, shape index: {}]   ;;  %s798_s5 = inlined_call_operand.vmem [shape: f32[1,256], index: 5, kind: input, shape index: {}]   ;;  %s799_s6 = inlined_call_operand.<no memory space> [shape: f32[1,1], index: 6, kind: input, shape index: {}]   ;;  %s800_s7 = inlined_call_operand.hbm [shape: f32[8,128], index: 7, kind: output, shape index: {}]  }
   0x1   :  { %v12_v0 = vstv %s799_s6 }
   0x2   :  { %13 = vst [vmem:[#allocation2] sm:$0x1] %v12_v0 }
   0x3   :  { %14 = vsyncpa [#allocation4], 0 }
   0x4   :  { %15 = vsyncpa [#allocation7], 0 }
   0x5   :  { %16 = vsyncpa [#allocation10], 0  ;;  %s33_s28 = sshll.u32 %s794_s1, 4  ;;  %s34_s28 = int_to_ptr.hbm [resolvable:$true] %s33_s28 }
   0x6   :  { %17 = vsyncpa [#allocation5], 0  ;;  %s719_s29 = smov [#allocation6]   ;;  %s23_s10 = sshll.u32 %s793_s0, 4  ;;  %s24_s10 = int_to_ptr.hbm [resolvable:$true] %s23_s10 }
   0x7   :  { %s35_s30 = sshll.u32 %s719_s29, 4  ;;  %s720_s11 = smov 512   ;;  %s36_s30 = int_to_ptr.vmem [resolvable:$true] %s35_s30 }
   0x8   :  { %s721_s12 = smov 32   ;;  %s722_s6 = smov [#allocation3]  }
   0x9   :  { %41 = dma.hbm_to_vmem [thread:$0]  %s34_s28, 2048, %s36_s30, [#allocation7], %s720_s11, %s720_s11, %s721_s12  }
   0xa   :  { %s25_s13 = sshll.u32 %s722_s6, 4  ;;  %s47_s16 = sshll.u32 %s795_s2, 4  ;;  %s26_s13 = int_to_ptr.vmem [resolvable:$true] %s25_s13  ;;  %s48_s16 = int_to_ptr.hbm [resolvable:$true] %s47_s16 }
   0xb   :  { %28 = dma.hbm_to_vmem [thread:$0]  %s24_s10, 128, %s26_s13, [#allocation4]  }
   0xc   :  { %s57_s18 = sshll.u32 %s796_s3, 4  ;;  %s723_s19 = smov [#allocation8]   ;;  %s58_s18 = int_to_ptr.hbm [resolvable:$true] %s57_s18 }
   0xd   :  { %s49_s20 = sshll.u32 %s723_s19, 4  ;;  %s724_s0 = smov [#allocation9]   ;;  %s50_s20 = int_to_ptr.vmem [resolvable:$true] %s49_s20 }
   0xe   :  { %52 = dma.hbm_to_vmem [thread:$0]  %s48_s16, 64, %s50_s20, [#allocation7]  }
   0xf   :  { %s59_s21 = sshll.u32 %s724_s0, 4  ;;  %s725_s22 = smov 256   ;;  %s60_s21 = int_to_ptr.vmem [resolvable:$true] %s59_s21 }
  0x10   :  { %s726_s23 = smov 16  }
  0x11   :  { %65 = dma.hbm_to_vmem [thread:$0]  %s58_s18, 16384, %s60_s21, [#allocation10], %s725_s22, %s725_s22, %s726_s23  }
  0x12   :  { %711 = dma.done.wait [#allocation4], 128  }
  0x13   :  { %712 = vsyncadd [#allocation4], 4294967168 }
  0x14   :  { %713 = dma.done.wait [#allocation7], 2112  }
  0x15   :  { %714 = vsyncadd [#allocation7], 4294965184 }
  0x16   :  { %715 = dma.done.wait [#allocation10], 16384  }
  0x17   :  { %716 = vsyncadd [#allocation10], 4294950912  ;;  %v101_v1 = vld [vmem:[#allocation6 + $0x60] sm:$0xff]  ;;  %v102_v2 = vld [vmem:[#allocation6 + $0x68] sm:$0xff]  ;;  %vm115_vm0 = vcmask 261120   ;;  %s559_s28 = sshll.u32 %s800_s7, 4  ;;  %s560_s28 = int_to_ptr.hbm [resolvable:$true] %s559_s28 }
  0x18   :  { %v103_v3 = vld [vmem:[#allocation6 + $0x70] sm:$0xff]  ;;  %131 = vmatpush.msra.mxu0 %v101_v1  ;;  %151 = vmatpush.msra.mxu1 %v102_v2  ;;  %v104_v4 = vld [vmem:[#allocation6 + $0x78] sm:$0xff]  ;;  %v97_v5 = vld [vmem:[#allocation6 + $0x40] sm:$0xff] }
  0x19   :  { %v98_v6 = vld [vmem:[#allocation6 + $0x48] sm:$0xff]  ;;  %171 = vmatpush.msra.mxu2 %v103_v3  ;;  %191 = vmatpush.msra.mxu3 %v104_v4  ;;  %v99_v7 = vld [vmem:[#allocation6 + $0x50] sm:$0xff]  ;;  %v100_v8 = vld [vmem:[#allocation6 + $0x58] sm:$0xff] }
  0x1a   :  { %v93_v9 = vld [vmem:[#allocation6 + $0x20] sm:$0xff]  ;;  %132 = vmatpush.msra.mxu0 %v97_v5  ;;  %152 = vmatpush.msra.mxu1 %v98_v6  ;;  %v94_v10 = vld [vmem:[#allocation6 + $0x28] sm:$0xff]  ;;  %v95_v11 = vld [vmem:[#allocation6 + $0x30] sm:$0xff] }
  0x1b   :  { %v96_v12 = vld [vmem:[#allocation6 + $0x38] sm:$0xff]  ;;  %172 = vmatpush.msra.mxu2 %v99_v7  ;;  %192 = vmatpush.msra.mxu3 %v100_v8  ;;  %v89_v13 = vld [vmem:[#allocation6] sm:$0xff]  ;;  %v90_v14 = vld [vmem:[#allocation6 + $0x8] sm:$0xff] }
  0x1c   :  { %133 = vmatpush.msra.mxu0 %v93_v9  ;;  %153 = vmatpush.msra.mxu1 %v94_v10  ;;  %v91_v15 = vld [vmem:[#allocation6 + $0x10] sm:$0xff]  ;;  %v92_v16 = vld [vmem:[#allocation6 + $0x18] sm:$0xff]  ;;  %v239_v22 = vld [vmem:[#allocation9 + $0xe0] sm:$0xff] }
  0x1d   :  { %173 = vmatpush.msra.mxu2 %v95_v11  ;;  %193 = vmatpush.msra.mxu3 %v96_v12  ;;  %v88_v17 = vld [vmem:[#allocation3] sm:$0xff]  ;;  %v271_v23 = vld [vmem:[#allocation9 + $0x1e0] sm:$0xff] }
  0x1e   :  { %134 = vmatpush.msra.mxu0 %v89_v13  ;;  %154 = vmatpush.msra.mxu1 %v90_v14  ;;  %v241_v18 = vld [vmem:[#allocation9 + $0xf0] sm:$0xff]  ;;  %v303_v24 = vld [vmem:[#allocation9 + $0x2e0] sm:$0xff] }
  0x1f   :  { %174 = vmatpush.msra.mxu2 %v91_v15  ;;  %194 = vmatpush.msra.mxu3 %v92_v16  ;;  %v273_v19 = vld [vmem:[#allocation9 + $0x1f0] sm:$0xff]  ;;  %v335_v25 = vld [vmem:[#allocation9 + $0x3e0] sm:$0xff]  ;;  %v242_v16 = vld [vmem:[#allocation9 + $0xf8] sm:$0xff] }
  0x20   :  { %571 = vmatmul.msk.f32.vlgmr.msra.gmra.mxu0 %vm115_vm0, %v88_v17  ;;  %572 = vmatmul.msk.f32.vlgmr.msra.gmra.mxu1 %vm115_vm0, %v88_v17  ;;  %v305_v20 = vld [vmem:[#allocation9 + $0x2f0] sm:$0xff]  ;;  %v235_v30 = vld [vmem:[#allocation9 + $0xc0] sm:$0xff] }
  0x21   :  { %v337_v21 = vld [vmem:[#allocation9 + $0x3f0] sm:$0xff]  ;;  %573 = vmatmul.msk.f32.vlgmr.msra.gmra.mxu2 %vm115_vm0, %v88_v17  ;;  %574 = vmatmul.msk.f32.vlgmr.msra.gmra.mxu3 %vm115_vm0, %v88_v17  ;;  %v267_v31 = vld [vmem:[#allocation9 + $0x1c0] sm:$0xff]  ;;  %v274_v17 = vld [vmem:[#allocation9 + $0x1f8] sm:$0xff] }
  0x22   :  { %345 = vmatpush.msrb.mxu0 %v241_v18  ;;  %365 = vmatpush.msrb.mxu1 %v273_v19  ;;  %v237_v26 = vld [vmem:[#allocation9 + $0xd0] sm:$0xff]  ;;  %v299_v32 = vld [vmem:[#allocation9 + $0x2c0] sm:$0xff] }
  0x23   :  { %v269_v27 = vld [vmem:[#allocation9 + $0x1d0] sm:$0xff]  ;;  %385 = vmatpush.msrb.mxu2 %v305_v20  ;;  %405 = vmatpush.msrb.mxu3 %v337_v21  ;;  %v331_v33 = vld [vmem:[#allocation9 + $0x3c0] sm:$0xff]  ;;  %v240_v20 = vld [vmem:[#allocation9 + $0xe8] sm:$0xff] }
  0x24   :  { %346 = vmatpush.msrb.mxu0 %v239_v22  ;;  %366 = vmatpush.msrb.mxu1 %v271_v23  ;;  %v301_v28 = vld [vmem:[#allocation9 + $0x2d0] sm:$0xff]  ;;  %v231_v38 = vld [vmem:[#allocation9 + $0xa0] sm:$0xff]  ;;  %v272_v21 = vld [vmem:[#allocation9 + $0x1e8] sm:$0xff] }
  0x25   :  { %v333_v29 = vld [vmem:[#allocation9 + $0x3d0] sm:$0xff]  ;;  %386 = vmatpush.msrb.mxu2 %v303_v24  ;;  %406 = vmatpush.msrb.mxu3 %v335_v25  ;;  %v263_v39 = vld [vmem:[#allocation9 + $0x1a0] sm:$0xff]  ;;  %v306_v22 = vld [vmem:[#allocation9 + $0x2f8] sm:$0xff] }
  0x26   :  { %347 = vmatpush.msrb.mxu0 %v237_v26  ;;  %367 = vmatpush.msrb.mxu1 %v269_v27  ;;  %v233_v34 = vld [vmem:[#allocation9 + $0xb0] sm:$0xff]  ;;  %v295_v40 = vld [vmem:[#allocation9 + $0x2a0] sm:$0xff]  ;;  %v338_v23 = vld [vmem:[#allocation9 + $0x3f8] sm:$0xff] }
  0x27   :  { %v265_v35 = vld [vmem:[#allocation9 + $0x1b0] sm:$0xff]  ;;  %387 = vmatpush.msrb.mxu2 %v301_v28  ;;  %407 = vmatpush.msrb.mxu3 %v333_v29  ;;  %v327_v41 = vld [vmem:[#allocation9 + $0x3a0] sm:$0xff]  ;;  %v238_v24 = vld [vmem:[#allocation9 + $0xd8] sm:$0xff] }
  0x28   :  { %348 = vmatpush.msrb.mxu0 %v235_v30  ;;  %368 = vmatpush.msrb.mxu1 %v267_v31  ;;  %v297_v36 = vld [vmem:[#allocation9 + $0x2b0] sm:$0xff]  ;;  %v227_v46 = vld [vmem:[#allocation9 + $0x80] sm:$0xff]  ;;  %v270_v25 = vld [vmem:[#allocation9 + $0x1d8] sm:$0xff] }
  0x29   :  { %v329_v37 = vld [vmem:[#allocation9 + $0x3b0] sm:$0xff]  ;;  %388 = vmatpush.msrb.mxu2 %v299_v32  ;;  %408 = vmatpush.msrb.mxu3 %v331_v33  ;;  %v259_v47 = vld [vmem:[#allocation9 + $0x180] sm:$0xff]  ;;  %v304_v26 = vld [vmem:[#allocation9 + $0x2e8] sm:$0xff] }
  0x2a   :  { %349 = vmatpush.msrb.mxu0 %v233_v34  ;;  %369 = vmatpush.msrb.mxu1 %v265_v35  ;;  %v229_v42 = vld [vmem:[#allocation9 + $0x90] sm:$0xff]  ;;  %v291_v48 = vld [vmem:[#allocation9 + $0x280] sm:$0xff]  ;;  %v336_v27 = vld [vmem:[#allocation9 + $0x3e8] sm:$0xff] }
  0x2b   :  { %v261_v43 = vld [vmem:[#allocation9 + $0x190] sm:$0xff]  ;;  %389 = vmatpush.msrb.mxu2 %v297_v36  ;;  %409 = vmatpush.msrb.mxu3 %v329_v37  ;;  %v323_v49 = vld [vmem:[#allocation9 + $0x380] sm:$0xff]  ;;  %v236_v28 = vld [vmem:[#allocation9 + $0xc8] sm:$0xff] }
  0x2c   :  { %350 = vmatpush.msrb.mxu0 %v231_v38  ;;  %370 = vmatpush.msrb.mxu1 %v263_v39  ;;  %v293_v44 = vld [vmem:[#allocation9 + $0x290] sm:$0xff]  ;;  %v223_v54 = vld [vmem:[#allocation9 + $0x60] sm:$0xff]  ;;  %v268_v29 = vld [vmem:[#allocation9 + $0x1c8] sm:$0xff] }
  0x2d   :  { %v325_v45 = vld [vmem:[#allocation9 + $0x390] sm:$0xff]  ;;  %390 = vmatpush.msrb.mxu2 %v295_v40  ;;  %410 = vmatpush.msrb.mxu3 %v327_v41  ;;  %v255_v55 = vld [vmem:[#allocation9 + $0x160] sm:$0xff]  ;;  %v302_v30 = vld [vmem:[#allocation9 + $0x2d8] sm:$0xff] }
  0x2e   :  { %351 = vmatpush.msrb.mxu0 %v229_v42  ;;  %371 = vmatpush.msrb.mxu1 %v261_v43  ;;  %v225_v50 = vld [vmem:[#allocation9 + $0x70] sm:$0xff]  ;;  %v287_v56 = vld [vmem:[#allocation9 + $0x260] sm:$0xff]  ;;  %v334_v31 = vld [vmem:[#allocation9 + $0x3d8] sm:$0xff] }
  0x2f   :  { %v257_v51 = vld [vmem:[#allocation9 + $0x170] sm:$0xff]  ;;  %391 = vmatpush.msrb.mxu2 %v293_v44  ;;  %411 = vmatpush.msrb.mxu3 %v325_v45  ;;  %v319_v57 = vld [vmem:[#allocation9 + $0x360] sm:$0xff]  ;;  %v234_v32 = vld [vmem:[#allocation9 + $0xb8] sm:$0xff] }
  0x30   :  { %352 = vmatpush.msrb.mxu0 %v227_v46  ;;  %372 = vmatpush.msrb.mxu1 %v259_v47  ;;  %v289_v52 = vld [vmem:[#allocation9 + $0x270] sm:$0xff]  ;;  %v219_v62 = vld [vmem:[#allocation9 + $0x40] sm:$0xff]  ;;  %v266_v33 = vld [vmem:[#allocation9 + $0x1b8] sm:$0xff] }
  0x31   :  { %v321_v53 = vld [vmem:[#allocation9 + $0x370] sm:$0xff]  ;;  %392 = vmatpush.msrb.mxu2 %v291_v48  ;;  %412 = vmatpush.msrb.mxu3 %v323_v49  ;;  %v251_v63 = vld [vmem:[#allocation9 + $0x140] sm:$0xff]  ;;  %v300_v34 = vld [vmem:[#allocation9 + $0x2c8] sm:$0xff] }
  0x32   :  { %353 = vmatpush.msrb.mxu0 %v225_v50  ;;  %373 = vmatpush.msrb.mxu1 %v257_v51  ;;  %v221_v58 = vld [vmem:[#allocation9 + $0x50] sm:$0xff]  ;;  %v283_v0 = vld [vmem:[#allocation9 + $0x240] sm:$0xff]  ;;  %v332_v35 = vld [vmem:[#allocation9 + $0x3c8] sm:$0xff] }
  0x33   :  { %v253_v59 = vld [vmem:[#allocation9 + $0x150] sm:$0xff]  ;;  %393 = vmatpush.msrb.mxu2 %v289_v52  ;;  %413 = vmatpush.msrb.mxu3 %v321_v53  ;;  %v315_v1 = vld [vmem:[#allocation9 + $0x340] sm:$0xff]  ;;  %v232_v36 = vld [vmem:[#allocation9 + $0xa8] sm:$0xff] }
  0x34   :  { %354 = vmatpush.msrb.mxu0 %v223_v54  ;;  %374 = vmatpush.msrb.mxu1 %v255_v55  ;;  %v285_v60 = vld [vmem:[#allocation9 + $0x250] sm:$0xff]  ;;  %v215_v6 = vld [vmem:[#allocation9 + $0x20] sm:$0xff]  ;;  %v264_v37 = vld [vmem:[#allocation9 + $0x1a8] sm:$0xff] }
  0x35   :  { %v317_v61 = vld [vmem:[#allocation9 + $0x350] sm:$0xff]  ;;  %394 = vmatpush.msrb.mxu2 %v287_v56  ;;  %414 = vmatpush.msrb.mxu3 %v319_v57  ;;  %v247_v7 = vld [vmem:[#allocation9 + $0x120] sm:$0xff]  ;;  %v298_v38 = vld [vmem:[#allocation9 + $0x2b8] sm:$0xff] }
  0x36   :  { %355 = vmatpush.msrb.mxu0 %v221_v58  ;;  %375 = vmatpush.msrb.mxu1 %v253_v59  ;;  %v217_v2 = vld [vmem:[#allocation9 + $0x30] sm:$0xff]  ;;  %v279_v8 = vld [vmem:[#allocation9 + $0x220] sm:$0xff]  ;;  %v330_v39 = vld [vmem:[#allocation9 + $0x3b8] sm:$0xff] }
  0x37   :  { %v249_v3 = vld [vmem:[#allocation9 + $0x130] sm:$0xff]  ;;  %395 = vmatpush.msrb.mxu2 %v285_v60  ;;  %415 = vmatpush.msrb.mxu3 %v317_v61  ;;  %v311_v9 = vld [vmem:[#allocation9 + $0x320] sm:$0xff]  ;;  %v230_v40 = vld [vmem:[#allocation9 + $0x98] sm:$0xff] }
  0x38   :  { %356 = vmatpush.msrb.mxu0 %v219_v62  ;;  %376 = vmatpush.msrb.mxu1 %v251_v63  ;;  %v281_v4 = vld [vmem:[#allocation9 + $0x230] sm:$0xff]  ;;  %v211_v14 = vld [vmem:[#allocation9] sm:$0xff]  ;;  %v262_v41 = vld [vmem:[#allocation9 + $0x198] sm:$0xff] }
  0x39   :  { %v313_v5 = vld [vmem:[#allocation9 + $0x330] sm:$0xff]  ;;  %396 = vmatpush.msrb.mxu2 %v283_v0  ;;  %416 = vmatpush.msrb.mxu3 %v315_v1  ;;  %v243_v15 = vld [vmem:[#allocation9 + $0x100] sm:$0xff]  ;;  %v296_v42 = vld [vmem:[#allocation9 + $0x2a8] sm:$0xff] }
  0x3a   :  { %357 = vmatpush.msrb.mxu0 %v217_v2  ;;  %377 = vmatpush.msrb.mxu1 %v249_v3  ;;  %v213_v10 = vld [vmem:[#allocation9 + $0x10] sm:$0xff]  ;;  %v275_v18 = vld [vmem:[#allocation9 + $0x200] sm:$0xff]  ;;  %v328_v43 = vld [vmem:[#allocation9 + $0x3a8] sm:$0xff] }
  0x3b   :  { %v245_v11 = vld [vmem:[#allocation9 + $0x110] sm:$0xff]  ;;  %397 = vmatpush.msrb.mxu2 %v281_v4  ;;  %417 = vmatpush.msrb.mxu3 %v313_v5  ;;  %v307_v19 = vld [vmem:[#allocation9 + $0x300] sm:$0xff]  ;;  %v228_v44 = vld [vmem:[#allocation9 + $0x88] sm:$0xff] }
  0x3c   :  { %358 = vmatpush.msrb.mxu0 %v215_v6  ;;  %378 = vmatpush.msrb.mxu1 %v247_v7  ;;  %v277_v12 = vld [vmem:[#allocation9 + $0x210] sm:$0xff]  ;;  %v260_v45 = vld [vmem:[#allocation9 + $0x188] sm:$0xff]  ;;  %v226_v46 = vld [vmem:[#allocation9 + $0x78] sm:$0xff] }
  0x3d   :  { %v309_v13 = vld [vmem:[#allocation9 + $0x310] sm:$0xff]  ;;  %398 = vmatpush.msrb.mxu2 %v279_v8  ;;  %418 = vmatpush.msrb.mxu3 %v311_v9  ;;  %v258_v47 = vld [vmem:[#allocation9 + $0x178] sm:$0xff]  ;;  %v224_v48 = vld [vmem:[#allocation9 + $0x68] sm:$0xff] }
  0x3e   :  { %359 = vmatpush.msrb.mxu0 %v213_v10  ;;  %379 = vmatpush.msrb.mxu1 %v245_v11  ;;  %v256_v49 = vld [vmem:[#allocation9 + $0x168] sm:$0xff]  ;;  %v294_v50 = vld [vmem:[#allocation9 + $0x298] sm:$0xff] }
  0x3f   :  { %399 = vmatpush.msrb.mxu2 %v277_v12  ;;  %419 = vmatpush.msrb.mxu3 %v309_v13  ;;  %v326_v51 = vld [vmem:[#allocation9 + $0x398] sm:$0xff]  ;;  %v292_v54 = vld [vmem:[#allocation9 + $0x288] sm:$0xff] }
  0x40   :  { %360 = vmatpush.msrb.mxu0 %v211_v14  ;;  %380 = vmatpush.msrb.mxu1 %v243_v15  ;;  %v222_v52 = vld [vmem:[#allocation9 + $0x58] sm:$0xff]  ;;  %v324_v55 = vld [vmem:[#allocation9 + $0x388] sm:$0xff] }
  0x41   :  { %400 = vmatpush.msrb.mxu2 %v275_v18  ;;  %420 = vmatpush.msrb.mxu3 %v307_v19  ;;  %v254_v53 = vld [vmem:[#allocation9 + $0x158] sm:$0xff]  ;;  %v220_v56 = vld [vmem:[#allocation9 + $0x48] sm:$0xff] }
  0x42   :  { %425 = vmatpush.msra.mxu0 %v242_v16  ;;  %445 = vmatpush.msra.mxu1 %v274_v17  ;;  %v252_v57 = vld [vmem:[#allocation9 + $0x148] sm:$0xff]  ;;  %v290_v58 = vld [vmem:[#allocation9 + $0x278] sm:$0xff] }
  0x43   :  { %465 = vmatpush.msra.mxu2 %v306_v22  ;;  %485 = vmatpush.msra.mxu3 %v338_v23  ;;  %v322_v59 = vld [vmem:[#allocation9 + $0x378] sm:$0xff]  ;;  %v288_v62 = vld [vmem:[#allocation9 + $0x268] sm:$0xff] }
  0x44   :  { %426 = vmatpush.msra.mxu0 %v240_v20  ;;  %446 = vmatpush.msra.mxu1 %v272_v21  ;;  %v218_v60 = vld [vmem:[#allocation9 + $0x38] sm:$0xff]  ;;  %v320_v63 = vld [vmem:[#allocation9 + $0x368] sm:$0xff] }
  0x45   :  { %466 = vmatpush.msra.mxu2 %v304_v26  ;;  %486 = vmatpush.msra.mxu3 %v336_v27  ;;  %v250_v61 = vld [vmem:[#allocation9 + $0x138] sm:$0xff]  ;;  %v216_v0 = vld [vmem:[#allocation9 + $0x28] sm:$0xff] }
  0x46   :  { %427 = vmatpush.msra.mxu0 %v238_v24  ;;  %447 = vmatpush.msra.mxu1 %v270_v25  ;;  %v248_v1 = vld [vmem:[#allocation9 + $0x128] sm:$0xff]  ;;  %v286_v2 = vld [vmem:[#allocation9 + $0x258] sm:$0xff] }
  0x47   :  { %467 = vmatpush.msra.mxu2 %v302_v30  ;;  %487 = vmatpush.msra.mxu3 %v334_v31  ;;  %v318_v3 = vld [vmem:[#allocation9 + $0x358] sm:$0xff]  ;;  %v284_v6 = vld [vmem:[#allocation9 + $0x248] sm:$0xff] }
  0x48   :  { %428 = vmatpush.msra.mxu0 %v236_v28  ;;  %448 = vmatpush.msra.mxu1 %v268_v29  ;;  %v214_v4 = vld [vmem:[#allocation9 + $0x18] sm:$0xff]  ;;  %v316_v7 = vld [vmem:[#allocation9 + $0x348] sm:$0xff] }
  0x49   :  { %468 = vmatpush.msra.mxu2 %v300_v34  ;;  %488 = vmatpush.msra.mxu3 %v332_v35  ;;  %v246_v5 = vld [vmem:[#allocation9 + $0x118] sm:$0xff]  ;;  %v212_v8 = vld [vmem:[#allocation9 + $0x8] sm:$0xff] }
  0x4a   :  { %429 = vmatpush.msra.mxu0 %v234_v32  ;;  %449 = vmatpush.msra.mxu1 %v266_v33  ;;  %v244_v9 = vld [vmem:[#allocation9 + $0x108] sm:$0xff]  ;;  %v282_v10 = vld [vmem:[#allocation9 + $0x238] sm:$0xff] }
  0x4b   :  { %469 = vmatpush.msra.mxu2 %v298_v38  ;;  %489 = vmatpush.msra.mxu3 %v330_v39  ;;  %v314_v11 = vld [vmem:[#allocation9 + $0x338] sm:$0xff]  ;;  %v280_v12 = vld [vmem:[#allocation9 + $0x228] sm:$0xff]  ;;  %v339_v39 = vld [vmem:[%s797_s4] sm:$0x3]  ;;  %s728_s4 = smov [#allocation11]  }
  0x4c   :  { %430 = vmatpush.msra.mxu0 %v232_v36  ;;  %450 = vmatpush.msra.mxu1 %v264_v37  ;;  %v312_v13 = vld [vmem:[#allocation9 + $0x328] sm:$0xff]  ;;  %v278_v14 = vld [vmem:[#allocation9 + $0x218] sm:$0xff] }
  0x4d   :  { %470 = vmatpush.msra.mxu2 %v296_v42  ;;  %490 = vmatpush.msra.mxu3 %v328_v43  ;;  %v310_v15 = vld [vmem:[#allocation9 + $0x318] sm:$0xff]  ;;  %v276_v16 = vld [vmem:[#allocation9 + $0x208] sm:$0xff] }
  0x4e   :  { %431 = vmatpush.msra.mxu0 %v230_v40  ;;  %451 = vmatpush.msra.mxu1 %v262_v41  ;;  %v308_v17 = vld [vmem:[#allocation9 + $0x308] sm:$0xff]  ;;  %v105_v18 = vld [vmem:[#allocation8] sm:$0xf]  ;;  %v341_v41 = vperm.slane %v339_v39, 0 }
  0x4f   :  { %471 = vmatpush.msra.mxu2 %v294_v50  ;;  %491 = vmatpush.msra.mxu3 %v326_v51  ;;  %v107_v19 = vperm.slane %v105_v18, 0  ;;  %v108_v20 = vperm.slane %v105_v18, 1  ;;  %v109_v27 = vperm.slane %v105_v18, 2  ;;  %v110_v28 = vperm.slane %v105_v18, 3 }
  0x50   :  { %432 = vmatpush.msra.mxu0 %v228_v44  ;;  %452 = vmatpush.msra.mxu1 %v260_v45  ;;  %v342_v45 = vperm.slane %v339_v39, 1 }
  0x51   :  { %472 = vmatpush.msra.mxu2 %v292_v54  ;;  %492 = vmatpush.msra.mxu3 %v324_v55 }
  0x52   :  { %433 = vmatpush.msra.mxu0 %v226_v46  ;;  %453 = vmatpush.msra.mxu1 %v258_v47 }
  0x53   :  { %473 = vmatpush.msra.mxu2 %v290_v58  ;;  %493 = vmatpush.msra.mxu3 %v322_v59 }
  0x54   :  { %434 = vmatpush.msra.mxu0 %v224_v48  ;;  %454 = vmatpush.msra.mxu1 %v256_v49 }
  0x55   :  { %474 = vmatpush.msra.mxu2 %v288_v62  ;;  %494 = vmatpush.msra.mxu3 %v320_v63 }
  0x56   :  { %435 = vmatpush.msra.mxu0 %v222_v52  ;;  %455 = vmatpush.msra.mxu1 %v254_v53 }
  0x57   :  { %475 = vmatpush.msra.mxu2 %v286_v2  ;;  %495 = vmatpush.msra.mxu3 %v318_v3 }
  0x58   :  { %436 = vmatpush.msra.mxu0 %v220_v56  ;;  %456 = vmatpush.msra.mxu1 %v252_v57  ;;  %v511_v57 = vld [vmem:[%s798_s5] sm:$0x3]  ;;  %s557_s5 = sshll.u32 %s728_s4, 4  ;;  %s558_s5 = int_to_ptr.vmem [resolvable:$true] %s557_s5 }
  0x59   :  { %476 = vmatpush.msra.mxu2 %v284_v6  ;;  %496 = vmatpush.msra.mxu3 %v316_v7 }
  0x5a   :  { %437 = vmatpush.msra.mxu0 %v218_v60  ;;  %457 = vmatpush.msra.mxu1 %v250_v61  ;;  %v513_v60 = vperm.slane %v511_v57, 0  ;;  %v514_v61 = vperm.slane %v511_v57, 1 }
  0x5b   :  { %477 = vmatpush.msra.mxu2 %v282_v10  ;;  %497 = vmatpush.msra.mxu3 %v314_v11 }
  0x5c   :  { %438 = vmatpush.msra.mxu0 %v216_v0  ;;  %458 = vmatpush.msra.mxu1 %v248_v1 }
  0x5d   :  { %478 = vmatpush.msra.mxu2 %v280_v12  ;;  %498 = vmatpush.msra.mxu3 %v312_v13 }
  0x5e   :  { %439 = vmatpush.msra.mxu0 %v214_v4  ;;  %459 = vmatpush.msra.mxu1 %v246_v5  ;;  %v727_v4 = vmov 0   ;;  %v586_v5 = vld [vmem:[#allocation2] ss:$0 sm:$0xff] }
  0x5f   :  { %479 = vmatpush.msra.mxu2 %v278_v14  ;;  %499 = vmatpush.msra.mxu3 %v310_v15 }
  0x60   :  { %440 = vmatpush.msra.mxu0 %v212_v8  ;;  %460 = vmatpush.msra.mxu1 %v244_v9 }
  0x61   :  { %480 = vmatpush.msra.mxu2 %v276_v16  ;;  %500 = vmatpush.msra.mxu3 %v308_v17 }
  0x62   :  { %585 = vset.pattern.permute.xlu0 %v727_v4 }
  0x9d   :  { %v136_v21 = vpop.f32.mrf.mxu0  ;;  %v156_v22 = vpop.f32.mrf.mxu1 }
  0x9e   :  { %v137_v23 = vadd.f32 %v136_v21, %v107_v19  ;;  %v157_v24 = vadd.f32 %v156_v22, %v108_v20 }
  0xa0   :  { %v203_v25 = vmul.f32 0.2, %v137_v23  ;;  %v204_v26 = vmul.f32 0.2, %v157_v24  ;;  %vm199_vm1 = vcmp.gt.f32.partialorder %v137_v23, 0.0  ;;  %vm200_vm2 = vcmp.gt.f32.partialorder %v157_v24, 0.0 }
  0xa2   :  { %v207_v29 = vsel %vm199_vm1, %v137_v23, %v203_v25  ;;  %v208_v30 = vsel %vm200_vm2, %v157_v24, %v204_v26 }
  0xa3   :  { %361 = vmatmul.f32.vlgmr.msrb.gmra.mxu0 %v207_v29  ;;  %381 = vmatmul.f32.vlgmr.msrb.gmra.mxu1 %v208_v30 }
  0xa4   :  { %v176_v31 = vpop.f32.mrf.mxu2  ;;  %v196_v32 = vpop.f32.mrf.mxu3 }
  0xa5   :  { %v177_v33 = vadd.f32 %v176_v31, %v109_v27  ;;  %v197_v34 = vadd.f32 %v196_v32, %v110_v28 }
  0xa7   :  { %v205_v35 = vmul.f32 0.2, %v177_v33  ;;  %v206_v36 = vmul.f32 0.2, %v197_v34  ;;  %vm201_vm3 = vcmp.gt.f32.partialorder %v177_v33, 0.0  ;;  %vm202_vm4 = vcmp.gt.f32.partialorder %v197_v34, 0.0 }
  0xa9   :  { %v209_v37 = vsel %vm201_vm3, %v177_v33, %v205_v35  ;;  %v210_v38 = vsel %vm202_vm4, %v197_v34, %v206_v36 }
  0xaa   :  { %401 = vmatmul.f32.vlgmr.msrb.gmra.mxu2 %v209_v37  ;;  %421 = vmatmul.f32.vlgmr.msrb.gmra.mxu3 %v210_v38 }
  0xab   :  { %441 = vmatmul.f32.vlgmr.msra.gmra.mxu0 %v207_v29  ;;  %461 = vmatmul.f32.vlgmr.msra.gmra.mxu1 %v208_v30 }
  0xb2   :  { %481 = vmatmul.f32.vlgmr.msra.gmra.mxu2 %v209_v37  ;;  %501 = vmatmul.f32.vlgmr.msra.gmra.mxu3 %v210_v38 }
 0x120   :  { %v362_v40 = vpop.f32.mrf.mxu0  ;;  %v382_v43 = vpop.f32.mrf.mxu1 }
 0x121   :  { %v363_v42 = vadd.f32 %v362_v40, %v341_v41 }
 0x123   :  { %v383_v44 = vadd.f32 %v382_v43, %v363_v42 }
 0x128   :  { %v442_v46 = vpop.f32.mrf.mxu0  ;;  %v462_v52 = vpop.f32.mrf.mxu1 }
 0x129   :  { %v443_v50 = vadd.f32 %v442_v46, %v342_v45 }
 0x12b   :  { %v463_v53 = vadd.f32 %v462_v52, %v443_v50 }
 0x12d   :  { %v402_v47 = vpop.f32.mrf.mxu2  ;;  %v422_v48 = vpop.f32.mrf.mxu3 }
 0x12e   :  { %v403_v49 = vadd.f32 %v402_v47, %v383_v44 }
 0x130   :  { %v423_v51 = vadd.f32 %v422_v48, %v403_v49 }
 0x132   :  { %v507_v55 = vmul.f32 0.2, %v423_v51  ;;  %vm505_vm5 = vcmp.gt.f32.partialorder %v423_v51, 0.0 }
 0x134   :  { %v509_v63 = vsel %vm505_vm5, %v423_v51, %v507_v55 }
 0x135   :  { %v482_v54 = vpop.f32.mrf.mxu2  ;;  %v502_v58 = vpop.f32.mrf.mxu3  ;;  %v517_v1 = vmul.f32 %v513_v60, %v509_v63 }
 0x136   :  { %v483_v56 = vadd.f32 %v482_v54, %v463_v53 }
 0x138   :  { %v503_v59 = vadd.f32 %v502_v58, %v483_v56 }
 0x13a   :  { %vm506_vm6 = vcmp.gt.f32.partialorder %v503_v59, 0.0  ;;  %v508_v62 = vmul.f32 0.2, %v503_v59 }
 0x13c   :  { %v510_v0 = vsel %vm506_vm6, %v503_v59, %v508_v62 }
 0x13d   :  { %v518_v2 = vmul.f32 %v514_v61, %v510_v0 }
 0x13f   :  { %v519_v3 = vadd.f32 %v518_v2, %v517_v1 }
 0x141   :  { %520 = vadd.xlane.f32.xlu0 %v519_v3 }
 0x1b4   :  { %v521_v6 = vpop.xlane.xlu0 %520 }
 0x1b5   :  { %v526_v7 = vadd.f32 %v586_v5, %v521_v6 }
 0x1b7   :  { %v527_v8 = vsub.f32 0.0, %v526_v7 }
 0x1b9   :  { %v528_v9 = vmul.f32 1.442695, %v527_v8 }
 0x1bb   :  { %587 = vpow2.f32 %v528_v9 }
 0x1c1   :  { %v588_v10 = vpop.eup %587 }
 0x1c2   :  { %v530_v11 = vadd.f32 1.0, %v588_v10 }
 0x1c4   :  { %589 = vrcp.f32 %v530_v11  ;;  %v542_v15 = vand.u32 2147483648, %v530_v11  ;;  %v540_v17 = vand.u32 2147483647, %v530_v11  ;;  %vm536_vm8 = vweird.f32 %v530_v11 }
 0x1c6   :  { %v543_v19 = vor.u32 1.1754944e-38, %v542_v15  ;;  %vm541_vm10 = vcmp.eq.f32.partialorder %v540_v17, 8.507059e+37 }
 0x1ca   :  { %v590_v12 = vpop.eup %589 }
 0x1cb   :  { %v532_v13 = vmul.f32 %v590_v12, %v530_v11  ;;  %vm537_vm7 = vweird.f32 %v590_v12 }
 0x1cc   :  { %vm538_vm9 = vmor %vm536_vm8, %vm537_vm7 }
 0x1cd   :  { %v533_v14 = vsub.f32 1.0, %v532_v13 }
 0x1cf   :  { %v534_v16 = vmul.f32 %v590_v12, %v533_v14 }
 0x1d1   :  { %v535_v18 = vadd.f32 %v590_v12, %v534_v16 }
 0x1d3   :  { %v539_v20 = vsel %vm538_vm9, %v590_v12, %v535_v18 }
 0x1d4   :  { %v544_v21 = vsel %vm541_vm10, %v543_v19, %v539_v20 }
 0x1d5   :  { %548 = vperm.xlu0 %585, %v544_v21  }
 0x247   :  { %v549_v22 = vpop.permute.xlu0 %548 }
 0x248   :  { %551 = vst [vmem:[#allocation11] sm:$0xff] %v549_v22 }
 0x249   :  { %562 = dma.vmem_to_hbm [thread:$0]  %s558_s5, 128, %s560_s28, [#allocation5]  }
 0x24a   :  { %717 = dma.done.wait [#allocation5], 128  }
 0x24b   :  { %718 = vsyncadd [#allocation5], 4294967168 }
 0x24c   :  { %567 = vsyncpa [#allocation4], 1 }
 0x24d   :  { %568 = vsyncpa [#allocation7], 1 }
 0x24e   :  { %569 = vsyncpa [#allocation10], 1 }
 0x24f   :  { %570 = vsyncpa [#allocation5], 1 }

</bundles_post_ra>
